<compile_context>
chip_gen: v6e
topology: v6e:2x2x1
jax: 0.10.0
libtpu: 0.0.40
codegen_flags: <defaults>
</compile_context>

<pallas_src>
import functools

import jax
import jax.numpy as jnp
from jax import lax
from jax.experimental import pallas as pl
from jax.experimental.pallas import tpu as pltpu


def _round_up(x, m):
    return ((x + m - 1) // m) * m


def _conv_kx1_kernel(x_ref, w_ref, b_ref, o_ref, *, n_taps):
    """One grid step == T_OUT output time-steps for one M tile.

    x_ref: (T_IN, M_TILE, CC)      stride-folded input window (CC = s*C_in)
    w_ref: (n_taps*CC, C_out)      stride-folded, zero-padded, (KC_in)-major weight
    b_ref: (1, C_out)              bias (zeros if the module has no bias)
    o_ref: (T_OUT, M_TILE, C_out)  output tile
    """
    T_out, MT, C_out = o_ref.shape
    CC = x_ref.shape[-1]

    # Contiguous (stride-1 after the wrapper's stride fold) tap windows, fused
    # into a single im2col LHS -> one MXU matmul with contraction n_taps*CC
    # instead of K skinny matmuls + VALU accumulates.
    taps = [x_ref[pl.ds(j, T_out)] for j in range(n_taps)]   # each (T_out, MT, CC)
    lhs = taps[0] if n_taps == 1 else jnp.concatenate(taps, axis=-1)
    lhs = lhs.reshape(T_out * MT, n_taps * CC)               # MT % 8 == 0 -> layout-preserving

    acc = jnp.dot(lhs, w_ref[...], preferred_element_type=jnp.float32)
    acc = acc + b_ref[...].astype(jnp.float32)
    o_ref[...] = acc.reshape(T_out, MT, C_out).astype(o_ref.dtype)


def conv2d_kx1(x, weight, bias=None, stride=(1,), padding=(0,), *,
               t_out_block=16, m_block=128, compute_dtype=None):
    """Forward pass of the Conv2D module.

    x:      (N, C_in, H, W)   NCHW (PyTorch convention)
    weight: (C_out, C_in, K)  (the torch module adds the trailing 1 itself)
    bias:   (C_out,) or None
    stride/padding: 1-element sequences for the H axis (W axis is 1 / 0).
    compute_dtype: optionally jnp.bfloat16 for the MXU operands (accumulation
                   stays f32); default keeps the input dtype.
    Returns (N, C_out, H_out, W).
    """
    N, C_in, H, W = x.shape
    C_out, C_in_w, K = weight.shape
    assert C_in == C_in_w, "channel mismatch"
    s = int(stride[0])
    p = int(padding[0])
    assert s >= 1 and K >= 1
    H_out = (H + 2 * p - K) // s + 1
    assert H_out >= 1
    M = N * W

    # ---------------- tile choices ----------------
    T_OUT = max(1, min(int(t_out_block), H_out))     # output time-steps per grid step
    nT = pl.cdiv(H_out, T_OUT)
    H_out_pad = nT * T_OUT
    MT = min(_round_up(M, 8), _round_up(int(m_block), 8))   # sublane dim, multiple of 8
    M_pad = _round_up(M, MT)
    nM = M_pad // MT

    # ---------------- stride fold ----------------
    # View s consecutive (padded) input rows as one row of CC = s*C_in channels:
    # output t then needs folded rows [t, t + Kf) with Kf = ceil(K/s), stride 1.
    Kf = -(-K // s)
    CC = s * C_in
    T_IN = T_OUT + Kf - 1                 # folded rows per output block (halo incl.)
    R = H_out_pad + Kf - 1                # folded rows needed in total
    H_tot = R * s                         # original (padded) rows we lay out

    cdt = compute_dtype if compute_dtype is not None else x.dtype

    # ---------------- input relayout (fused by XLA into one pass) ----------------
    pad_end = max(H_tot - (H + p), 0)
    xp = jnp.pad(x, ((0, 0), (0, 0), (p, pad_end), (0, 0)))[:, :, :H_tot, :]
    xt = jnp.transpose(xp, (2, 0, 3, 1))                       # (H_tot, N, W, C_in)
    xt = xt.reshape(R, s, N, W, C_in).transpose(0, 2, 3, 1, 4) # (R, N, W, s, C_in)
    xt = xt.reshape(R, M, CC)                                  # (R, M, s*C_in)
    if M_pad > M:
        xt = jnp.pad(xt, ((0, 0), (0, M_pad - M), (0, 0)))
    # Halo-blocked windows: block t covers folded rows [t*T_OUT, t*T_OUT + T_IN).
    # Only ~(Kf-1)/T_OUT extra HBM bytes vs. the raw input; lets every grid step
    # use a plain block-aligned BlockSpec (no overlapping-window indexing).
    row_idx = (jnp.arange(nT) * T_OUT)[:, None] + jnp.arange(T_IN)[None, :]
    xw = xt[row_idx].astype(cdt)                               # (nT, T_IN, M_pad, CC)

    # ---------------- weight / bias relayout ----------------
    wt = jnp.transpose(weight, (2, 1, 0))                      # (K, C_in, C_out)
    wt = jnp.pad(wt, ((0, Kf * s - K), (0, 0), (0, 0)))        # zero taps beyond K
    wt = wt.reshape(Kf * CC, C_out).astype(cdt)                # (Kf*s*C_in, C_out)
    if bias is None:
        bt = jnp.zeros((1, C_out), jnp.float32)
    else:
        bt = bias.reshape(1, C_out).astype(jnp.float32)

    kernel = functools.partial(_conv_kx1_kernel, n_taps=Kf)

    y = pl.pallas_call(
        kernel,
        out_shape=jax.ShapeDtypeStruct((H_out_pad, M_pad, C_out), x.dtype),
        grid=(nT, nM),
        in_specs=[
            # Streamed, double-buffered input window (one per grid step).
            pl.BlockSpec((None, T_IN, MT, CC), lambda t, m: (t, 0, m, 0)),
            # Constant-index weight / bias: DMA'd once, reused across the grid.
            pl.BlockSpec((Kf * CC, C_out), lambda t, m: (0, 0)),
            pl.BlockSpec((1, C_out), lambda t, m: (0, 0)),
        ],
        out_specs=pl.BlockSpec((T_OUT, MT, C_out), lambda t, m: (t, m, 0)),
        compiler_params=pltpu.CompilerParams(
            # Both axes are fully independent -> megacore / 2-TC sharding (v7x).
            dimension_semantics=("parallel", "parallel"),
            # Explicit VMEM budget: tiles above are a few hundred KiB, well
            # inside 32 MiB on every generation (v5e/v6e/v7x).
            vmem_limit_bytes=32 * 1024 * 1024,
        ),
    )(xw, wt, bt)

    # ---------------- back to NCHW ----------------
    y = y[:H_out, :M].reshape(H_out, N, W, C_out).transpose(1, 3, 0, 2)
    return y


if __name__ == "__main__":
    key = jax.random.PRNGKey(0)
    k1, k2, k3 = jax.random.split(key, 3)

    # Small but lane-dense shapes (channel dims are multiples of 128 after the
    # stride fold: s*C_in = 128, C_out = 128), consistent with the module's
    # forward: NCHW input, (C_out, C_in, K) weight, 1-D conv along H.
    N, C_in, H, W = 2, 64, 64, 3
    C_out, K = 128, 5
    stride, padding = (2,), (2,)

    x = jax.random.normal(k1, (N, C_in, H, W), dtype=jnp.float32)
    weight = jax.random.normal(k2, (C_out, C_in, K), dtype=jnp.float32) * 0.1
    bias = jax.random.normal(k3, (C_out,), dtype=jnp.float32) * 0.1

    fwd = jax.jit(functools.partial(conv2d_kx1, stride=stride, padding=padding))
    y = jax.block_until_ready(fwd(x, weight, bias))

    # Reference check against XLA's convolution (same semantics as torch Conv2d).
    ref = lax.conv_general_dilated(
        x, weight[..., None],
        window_strides=(stride[0], 1),
        padding=((padding[0], padding[0]), (0, 0)),
        dimension_numbers=("NCHW", "OIHW", "NCHW"),
        precision=lax.Precision.HIGHEST,
    ) + bias[None, :, None, None]

    assert y.shape == ref.shape, (y.shape, ref.shape)
    max_err = float(jnp.max(jnp.abs(y - ref)))
    assert jnp.allclose(y, ref, atol=1e-3, rtol=1e-3), f"mismatch vs reference conv (max abs err {max_err})"
    print("KERNEL_OK")
</pallas_src>

<mosaic_0001>
module attributes {stable_mosaic.version = 11 : i64} {
  func.func @_conv_kx1_kernel(%arg0: i32, %arg1: i32, %arg2: memref<1x18x8x128xf32, #tpu.memory_space<vmem>>, %arg3: memref<384x128xf32, #tpu.memory_space<vmem>>, %arg4: memref<1x128xf32, #tpu.memory_space<vmem>>, %arg5: memref<16x8x128xf32, #tpu.memory_space<vmem>>) attributes {dimension_semantics = [#tpu.dimension_semantics<parallel>, #tpu.dimension_semantics<parallel>], iteration_bounds = array<i64: 2, 1>, scalar_prefetch = 0 : i64, scratch_operands = 0 : i64, tpu.core_type = #tpu.core_type<tc>, window_params = [{transform_indices = @transform_0, window_bounds = array<i64: 1, 18, 8, 128>}, {pipeline_mode = #tpu.pipeline_mode<synchronous>, transform_indices = @transform_1, window_bounds = array<i64: 384, 128>}, {pipeline_mode = #tpu.pipeline_mode<synchronous>, transform_indices = @transform_2, window_bounds = array<i64: 1, 128>}, {transform_indices = @transform_3, window_bounds = array<i64: 16, 8, 128>}]} {
    %c0 = arith.constant 0 : index
    %c0_0 = arith.constant 0 : index
    %c0_1 = arith.constant 0 : index
    %c0_2 = arith.constant 0 : index
    %0 = vector.load %arg2[%c0, %c0_0, %c0_1, %c0_2] : memref<1x18x8x128xf32, #tpu.memory_space<vmem>>, vector<1x16x8x128xf32>
    %1 = vector.shape_cast %0 : vector<1x16x8x128xf32> to vector<16x8x128xf32>
    %c0_3 = arith.constant 0 : index
    %c1 = arith.constant 1 : index
    %c0_4 = arith.constant 0 : index
    %c0_5 = arith.constant 0 : index
    %2 = vector.load %arg2[%c0_3, %c1, %c0_4, %c0_5] : memref<1x18x8x128xf32, #tpu.memory_space<vmem>>, vector<1x16x8x128xf32>
    %3 = vector.shape_cast %2 : vector<1x16x8x128xf32> to vector<16x8x128xf32>
    %c0_6 = arith.constant 0 : index
    %c2 = arith.constant 2 : index
    %c0_7 = arith.constant 0 : index
    %c0_8 = arith.constant 0 : index
    %4 = vector.load %arg2[%c0_6, %c2, %c0_7, %c0_8] : memref<1x18x8x128xf32, #tpu.memory_space<vmem>>, vector<1x16x8x128xf32>
    %5 = vector.shape_cast %4 : vector<1x16x8x128xf32> to vector<16x8x128xf32>
    %6 = tpu.concatenate %1, %3, %5 in 2 : vector<16x8x128xf32>, vector<16x8x128xf32>, vector<16x8x128xf32> -> vector<16x8x384xf32>
    %7 = vector.shape_cast %6 : vector<16x8x384xf32> to vector<128x384xf32>
    %c0_9 = arith.constant 0 : index
    %c0_10 = arith.constant 0 : index
    %8 = vector.load %arg3[%c0_9, %c0_10] : memref<384x128xf32, #tpu.memory_space<vmem>>, vector<384x128xf32>
    %cst = arith.constant dense<0.000000e+00> : vector<128x128xf32>
    %9 = tpu.matmul %7, %8, %cst {dimension_numbers = #tpu.dot_dimension_numbers<[1], [0], [0], [1], [0, 0, 1, 1], [], []>} : vector<128x384xf32>, vector<384x128xf32>, vector<128x128xf32> -> vector<128x128xf32>
    %c0_11 = arith.constant 0 : index
    %c0_12 = arith.constant 0 : index
    %10 = vector.load %arg4[%c0_11, %c0_12] : memref<1x128xf32, #tpu.memory_space<vmem>>, vector<1x128xf32>
    %11 = vector.broadcast %10 : vector<1x128xf32> to vector<128x128xf32>
    %12 = arith.addf %9, %11 : vector<128x128xf32>
    %13 = vector.shape_cast %12 : vector<128x128xf32> to vector<16x8x128xf32>
    %c0_13 = arith.constant 0 : index
    %c0_14 = arith.constant 0 : index
    %c0_15 = arith.constant 0 : index
    %14 = vector.load %arg5[%c0_13, %c0_14, %c0_15] : memref<16x8x128xf32, #tpu.memory_space<vmem>>, vector<16x8x128xf32>
    tpu.vector_store %arg5[%c0_13, %c0_14, %c0_15], %13 {strides = array<i32>} : memref<16x8x128xf32, #tpu.memory_space<vmem>>, vector<16x8x128xf32>,
    return
  }
  func.func @transform_0(%arg0: i32, %arg1: i32) -> (i32, i32, i32, i32) {
    %c0_i32 = arith.constant 0 : i32
    %c0_i32_0 = arith.constant 0 : i32
    %c0_i32_1 = arith.constant 0 : i32
    return %arg0, %c0_i32, %arg1, %c0_i32_0 : i32, i32, i32, i32
  }
  func.func @transform_1(%arg0: i32, %arg1: i32) -> (i32, i32) {
    %c0_i32 = arith.constant 0 : i32
    %c0_i32_0 = arith.constant 0 : i32
    %c0_i32_1 = arith.constant 0 : i32
    return %c0_i32, %c0_i32_0 : i32, i32
  }
  func.func @transform_2(%arg0: i32, %arg1: i32) -> (i32, i32) {
    %c0_i32 = arith.constant 0 : i32
    %c0_i32_0 = arith.constant 0 : i32
    %c0_i32_1 = arith.constant 0 : i32
    return %c0_i32, %c0_i32_0 : i32, i32
  }
  func.func @transform_3(%arg0: i32, %arg1: i32) -> (i32, i32, i32) {
    %c0_i32 = arith.constant 0 : i32
    %c0_i32_0 = arith.constant 0 : i32
    return %arg0, %arg1, %c0_i32 : i32, i32, i32
  }
}

</mosaic_0001>

<bundles_post_ra>
// kernel: conv2d_kx1.1
= control target key start
LH: loop header
LB: loop body
LE: loop exit
PB: predicated region body
PF: predicated region fallthrough
CT: control target
= control target key end

     0   :  { %s975_s12 = smov 0   ;;  %s977_s13 = smov 0   ;;  %s1221_s0 = inlined_call_operand.vmem [shape: f32[2,18,8,128], index: 0, kind: input, shape index: {}]   ;;  %s1222_s1 = inlined_call_operand.vmem [shape: f32[384,128], index: 1, kind: input, shape index: {}]   ;;  %s1223_s2 = inlined_call_operand.vmem [shape: f32[1,128], index: 2, kind: input, shape index: {}]   ;;  %s1224_s3 = inlined_call_operand.vmem [shape: f32[32,8,128], index: 3, kind: output, shape index: {}]  }
   0x1   :  { %s979_s14 = smov 0  }
   0x2 LB: > { %s25_s15 = sadd.s32 1, %s949_s13  ;;  %p699_p0 = scmp.ge.s32.totalorder %s953_s14, 1  ;;  %s953_s14 = sphi %s979_s14, %s13_s14   ;;  %s949_s13 = sphi %s977_s13, %s1226_s13   ;;  %s945_s12 = sphi %s975_s12, %s1225_s12  }
   0x3   : > { %p27_p1 = scmp.ge.s32.totalorder %s25_s15, 2  ;;  %p156_p2 = scmp.lt.s32.totalorder %s953_s14, 3 }
   0x5   : > { %s1228_s15 = smov (%p27_p1, %s25_s15), 0  ;;  %p157_p3 = pnand %p699_p0, %p156_p2 }
   0x6   : > { %p186_p4 = scmp.lt.s32.totalorder (!%p157_p3), %s945_s12, 1  ;;  %s701_s25 = sshll.u32 (!%p157_p3), %s945_s12, 4 }
   0x7   : > { %160 = sbr.rel (%p157_p3) target bundleno = 307 (0x133), region = 32  ;;  %p195_p5 = scmp.lt.s32.totalorder (!%p157_p3), %s701_s25, 31 }
   0xc   : > { %v284_v0 = vld [vmem:[%s1222_s1 + $0xf8] sm:$0xff]  ;;  %v283_v2 = vld [vmem:[%s1222_s1 + $0xf0] sm:$0xff]  ;;  %v282_v5 = vld [vmem:[%s1222_s1 + $0xe8] sm:$0xff]  ;;  %s1080_s24 = scalar_select %p186_p4, %s945_s12, 1 }
   0xd   : > { %v268_v1 = vld [vmem:[%s1222_s1 + $0x78] sm:$0xff]  ;;  %738 = vmatprep.subr.mxu0 %v284_v0  ;;  %v267_v3 = vld [vmem:[%s1222_s1 + $0x70] sm:$0xff]  ;;  %v266_v7 = vld [vmem:[%s1222_s1 + $0x68] sm:$0xff]  ;;  %s1230_s25 = smov (!%p195_p5, %s701_s25), 31 }
   0xe   : > { %v300_v4 = vld [vmem:[%s1222_s1 + $0x178] sm:$0xff]  ;;  %739 = vmatpush3.msra.mxu0 %v268_v1  ;;  %v299_v6 = vld [vmem:[%s1222_s1 + $0x170] sm:$0xff]  ;;  %v298_v8 = vld [vmem:[%s1222_s1 + $0x168] sm:$0xff]  ;;  %s906_s10 = smul.u32 144, %s1080_s24  ;;  %s702_s28 = sshll.u32 %s1230_s25, 3 }
   0xf   : > { %850 = vmatprep.subr.mxu1 %v300_v4  ;;  %740 = vmatprep.subr.mxu0 %v283_v2  ;;  %v281_v9 = vld [vmem:[%s1222_s1 + $0xe0] sm:$0xff]  ;;  %v280_v12 = vld [vmem:[%s1222_s1 + $0xd8] sm:$0xff]  ;;  %v279_v15 = vld [vmem:[%s1222_s1 + $0xd0] sm:$0xff]  ;;  %s1179_s12 = scalar_lea.vmem %s1224_s3, %s702_s28 }
  0x10   : > { %851 = vmatpush3.msra.mxu1 %v300_v4  ;;  %741 = vmatpush3.msra.mxu0 %v267_v3  ;;  %v265_v10 = vld [vmem:[%s1222_s1 + $0x60] sm:$0xff]  ;;  %v264_v13 = vld [vmem:[%s1222_s1 + $0x58] sm:$0xff]  ;;  %v263_v16 = vld [vmem:[%s1222_s1 + $0x50] sm:$0xff]  ;;  %s1122_s29 = scalar_lea.vmem %s1221_s0, %s906_s10 }
  0x11   : > { %852 = vmatprep.subr.mxu1 %v299_v6  ;;  %742 = vmatprep.subr.mxu0 %v282_v5  ;;  %v297_v11 = vld [vmem:[%s1222_s1 + $0x160] sm:$0xff]  ;;  %v296_v14 = vld [vmem:[%s1222_s1 + $0x158] sm:$0xff]  ;;  %v295_v17 = vld [vmem:[%s1222_s1 + $0x150] sm:$0xff] }
  0x12   : > { %853 = vmatpush3.msra.mxu1 %v299_v6  ;;  %743 = vmatpush3.msra.mxu0 %v266_v7  ;;  %v278_v18 = vld [vmem:[%s1222_s1 + $0xc8] sm:$0xff]  ;;  %v277_v21 = vld [vmem:[%s1222_s1 + $0xc0] sm:$0xff]  ;;  %v276_v24 = vld [vmem:[%s1222_s1 + $0xb8] sm:$0xff] }
  0x13   : > { %854 = vmatprep.subr.mxu1 %v298_v8  ;;  %744 = vmatprep.subr.mxu0 %v281_v9  ;;  %v262_v19 = vld [vmem:[%s1222_s1 + $0x48] sm:$0xff]  ;;  %v261_v22 = vld [vmem:[%s1222_s1 + $0x40] sm:$0xff]  ;;  %v260_v25 = vld [vmem:[%s1222_s1 + $0x38] sm:$0xff] }
  0x14   : > { %855 = vmatpush3.msra.mxu1 %v298_v8  ;;  %745 = vmatpush3.msra.mxu0 %v265_v10  ;;  %v294_v20 = vld [vmem:[%s1222_s1 + $0x148] sm:$0xff]  ;;  %v293_v23 = vld [vmem:[%s1222_s1 + $0x140] sm:$0xff]  ;;  %v292_v26 = vld [vmem:[%s1222_s1 + $0x138] sm:$0xff] }
  0x15   : > { %856 = vmatprep.subr.mxu1 %v297_v11  ;;  %746 = vmatprep.subr.mxu0 %v280_v12  ;;  %v275_v27 = vld [vmem:[%s1222_s1 + $0xb0] sm:$0xff]  ;;  %v274_v30 = vld [vmem:[%s1222_s1 + $0xa8] sm:$0xff]  ;;  %v273_v33 = vld [vmem:[%s1222_s1 + $0xa0] sm:$0xff] }
  0x16   : > { %857 = vmatpush3.msra.mxu1 %v297_v11  ;;  %747 = vmatpush3.msra.mxu0 %v264_v13  ;;  %v259_v28 = vld [vmem:[%s1222_s1 + $0x30] sm:$0xff]  ;;  %v258_v31 = vld [vmem:[%s1222_s1 + $0x28] sm:$0xff]  ;;  %v257_v34 = vld [vmem:[%s1222_s1 + $0x20] sm:$0xff] }
  0x17   : > { %858 = vmatprep.subr.mxu1 %v296_v14  ;;  %748 = vmatprep.subr.mxu0 %v279_v15  ;;  %v291_v29 = vld [vmem:[%s1222_s1 + $0x130] sm:$0xff]  ;;  %v290_v32 = vld [vmem:[%s1222_s1 + $0x128] sm:$0xff]  ;;  %v289_v35 = vld [vmem:[%s1222_s1 + $0x120] sm:$0xff] }
  0x18   : > { %859 = vmatpush3.msra.mxu1 %v296_v14  ;;  %749 = vmatpush3.msra.mxu0 %v263_v16  ;;  %v272_v36 = vld [vmem:[%s1222_s1 + $0x98] sm:$0xff]  ;;  %v271_v39 = vld [vmem:[%s1222_s1 + $0x90] sm:$0xff]  ;;  %v270_v42 = vld [vmem:[%s1222_s1 + $0x88] sm:$0xff] }
  0x19   : > { %860 = vmatprep.subr.mxu1 %v295_v17  ;;  %750 = vmatprep.subr.mxu0 %v278_v18  ;;  %v256_v37 = vld [vmem:[%s1222_s1 + $0x18] sm:$0xff]  ;;  %v255_v40 = vld [vmem:[%s1222_s1 + $0x10] sm:$0xff]  ;;  %v703_v43 = vld [vmem:[%s1122_s29 + $0x8] sm:$0xff] }
  0x1a   : > { %861 = vmatpush3.msra.mxu1 %v295_v17  ;;  %751 = vmatpush3.msra.mxu0 %v262_v19  ;;  %v288_v38 = vld [vmem:[%s1222_s1 + $0x118] sm:$0xff]  ;;  %v287_v41 = vld [vmem:[%s1222_s1 + $0x110] sm:$0xff]  ;;  %v254_v44 = vld [vmem:[%s1222_s1 + $0x8] sm:$0xff] }
  0x1b   : > { %862 = vmatprep.subr.mxu1 %v294_v20  ;;  %752 = vmatprep.subr.mxu0 %v277_v21  ;;  %v269_v45 = vld [vmem:[%s1222_s1 + $0x80] sm:$0xff]  ;;  %v286_v46 = vld [vmem:[%s1222_s1 + $0x108] sm:$0xff]  ;;  %v704_v50 = vld [vmem:[%s1122_s29 + $0x10] sm:$0xff] }
  0x1c   : > { %863 = vmatpush3.msra.mxu1 %v294_v20  ;;  %753 = vmatpush3.msra.mxu0 %v261_v22  ;;  %v253_v47 = vld [vmem:[%s1222_s1] sm:$0xff]  ;;  %v720_v51 = vld [vmem:[%s1122_s29 + $0x18] sm:$0xff]  ;;  %v722_v53 = vld [vmem:[%s1122_s29 + $0x28] sm:$0xff] }
  0x1d   : > { %864 = vmatprep.subr.mxu1 %v293_v23  ;;  %754 = vmatprep.subr.mxu0 %v276_v24  ;;  %v203_v48 = vld [vmem:[%s1122_s29] sm:$0xff]  ;;  %v708_v54 = vld [vmem:[%s1122_s29 + $0x30] sm:$0xff]  ;;  %v724_v55 = vld [vmem:[%s1122_s29 + $0x38] sm:$0xff] }
  0x1e   : > { %865 = vmatpush3.msra.mxu1 %v293_v23  ;;  %755 = vmatpush3.msra.mxu0 %v260_v25  ;;  %v285_v49 = vld [vmem:[%s1222_s1 + $0x100] sm:$0xff]  ;;  %v726_v57 = vld [vmem:[%s1122_s29 + $0x48] sm:$0xff]  ;;  %v712_v58 = vld [vmem:[%s1122_s29 + $0x50] sm:$0xff] }
  0x1f   : > { %866 = vmatprep.subr.mxu1 %v292_v26  ;;  %756 = vmatprep.subr.mxu0 %v275_v27  ;;  %v706_v52 = vld [vmem:[%s1122_s29 + $0x20] sm:$0xff]  ;;  %v728_v59 = vld [vmem:[%s1122_s29 + $0x58] sm:$0xff]  ;;  %v730_v61 = vld [vmem:[%s1122_s29 + $0x68] sm:$0xff] }
  0x20   : > { %867 = vmatpush3.msra.mxu1 %v292_v26  ;;  %757 = vmatpush3.msra.mxu0 %v259_v28  ;;  %v710_v56 = vld [vmem:[%s1122_s29 + $0x40] sm:$0xff]  ;;  %v716_v62 = vld [vmem:[%s1122_s29 + $0x70] sm:$0xff]  ;;  %v732_v63 = vld [vmem:[%s1122_s29 + $0x78] sm:$0xff] }
  0x21   : > { %868 = vmatprep.subr.mxu1 %v291_v29  ;;  %758 = vmatprep.subr.mxu0 %v274_v30  ;;  %v714_v60 = vld [vmem:[%s1122_s29 + $0x60] sm:$0xff]  ;;  %v734_v1 = vld [vmem:[%s1122_s29 + $0x88] sm:$0xff] }
  0x22   : > { %869 = vmatpush3.msra.mxu1 %v291_v29  ;;  %759 = vmatpush3.msra.mxu0 %v258_v31  ;;  %v718_v0 = vld [vmem:[%s1122_s29 + $0x80] sm:$0xff] }
  0x23   : > { %870 = vmatprep.subr.mxu1 %v290_v32  ;;  %760 = vmatprep.subr.mxu0 %v273_v33  ;;  %v1173_v4 = vld [vmem:[%s1223_s2] ss:$0 sm:$0xff] }
  0x24   : > { %871 = vmatpush3.msra.mxu1 %v290_v32  ;;  %761 = vmatpush3.msra.mxu0 %v257_v34 }
  0x25   : > { %872 = vmatprep.subr.mxu1 %v289_v35  ;;  %762 = vmatprep.subr.mxu0 %v272_v36 }
  0x26   : > { %873 = vmatpush3.msra.mxu1 %v289_v35  ;;  %763 = vmatpush3.msra.mxu0 %v256_v37 }
  0x27   : > { %874 = vmatprep.subr.mxu1 %v288_v38  ;;  %764 = vmatprep.subr.mxu0 %v271_v39 }
  0x28   : > { %875 = vmatpush3.msra.mxu1 %v288_v38  ;;  %765 = vmatpush3.msra.mxu0 %v255_v40 }
  0x29   : > { %876 = vmatprep.subr.mxu1 %v287_v41  ;;  %766 = vmatprep.subr.mxu0 %v270_v42 }
  0x2a   : > { %372 = vmatprep.mubr.f32.mxu0 %v703_v43  ;;  %767 = vmatpush3.msra.mxu0 %v254_v44 }
  0x2b   : > { %877 = vmatpush3.msra.mxu1 %v287_v41  ;;  %768 = vmatprep.subr.mxu0 %v269_v45 }
  0x2c   : > { %878 = vmatprep.subr.mxu1 %v286_v46  ;;  %769 = vmatpush3.msra.mxu0 %v253_v47 }
  0x2d   : > { %879 = vmatpush3.msra.mxu1 %v286_v46  ;;  %373 = vmatmul.mubr.f32.vlgmr.msra.gmra.mxu0 %v203_v48 }
  0x2e   : > { %880 = vmatprep.subr.mxu1 %v285_v49  ;;  %377 = vmatprep.mubr.f32.mxu0 %v704_v50 }
  0x2f   : > { %881 = vmatpush3.msra.mxu1 %v285_v49  ;;  %882 = vmatprep.mubr.f32.mxu1 %v704_v50 }
  0x30   : > { %883 = vmatmul.mubr.f32.vlgmr.msra.gmra.mxu1 %v720_v51 }
  0x31   : > { %378 = vmatmul.mubr.f32.gmra.mxu0 %v703_v43  ;;  %885 = vmatprep.mubr.f32.mxu1 %v706_v52 }
  0x32   : > { %382 = vmatprep.mubr.f32.mxu0 %v720_v51 }
  0x34   : > { %886 = vmatmul.mubr.f32.gmra.mxu1 %v722_v53 }
  0x35   : > { %383 = vmatmul.mubr.f32.gmra.mxu0 %v704_v50  ;;  %888 = vmatprep.mubr.f32.mxu1 %v708_v54 }
  0x36   : > { %387 = vmatprep.mubr.f32.mxu0 %v706_v52 }
  0x38   : > { %889 = vmatmul.mubr.f32.gmra.mxu1 %v724_v55 }
  0x39   : > { %388 = vmatmul.mubr.f32.gmra.mxu0 %v720_v51  ;;  %891 = vmatprep.mubr.f32.mxu1 %v710_v56 }
  0x3a   : > { %392 = vmatprep.mubr.f32.mxu0 %v722_v53 }
  0x3c   : > { %892 = vmatmul.mubr.f32.gmra.mxu1 %v726_v57 }
  0x3d   : > { %393 = vmatmul.mubr.f32.gmra.mxu0 %v706_v52  ;;  %894 = vmatprep.mubr.f32.mxu1 %v712_v58 }
  0x3e   : > { %397 = vmatprep.mubr.f32.mxu0 %v708_v54 }
  0x40   : > { %895 = vmatmul.mubr.f32.gmra.mxu1 %v728_v59 }
  0x41   : > { %398 = vmatmul.mubr.f32.gmra.mxu0 %v722_v53  ;;  %897 = vmatprep.mubr.f32.mxu1 %v714_v60 }
  0x42   : > { %402 = vmatprep.mubr.f32.mxu0 %v724_v55 }
  0x44   : > { %898 = vmatmul.mubr.f32.gmra.mxu1 %v730_v61 }
  0x45   : > { %403 = vmatmul.mubr.f32.gmra.mxu0 %v708_v54  ;;  %900 = vmatprep.mubr.f32.mxu1 %v716_v62 }
  0x46   : > { %407 = vmatprep.mubr.f32.mxu0 %v710_v56 }
  0x48   : > { %901 = vmatmul.mubr.f32.gmra.mxu1 %v732_v63 }
  0x49   : > { %408 = vmatmul.mubr.f32.gmra.mxu0 %v724_v55  ;;  %903 = vmatprep.mubr.f32.mxu1 %v718_v0 }
  0x4a   : > { %412 = vmatprep.mubr.f32.mxu0 %v726_v57 }
  0x4c   : > { %904 = vmatmul.mubr.f32.gmra.mxu1 %v734_v1 }
  0x4d   : > { %413 = vmatmul.mubr.f32.gmra.mxu0 %v710_v56 }
  0x4e   : > { %417 = vmatprep.mubr.f32.mxu0 %v712_v58 }
  0x51   : > { %418 = vmatmul.mubr.f32.gmra.mxu0 %v726_v57 }
  0x52   : > { %422 = vmatprep.mubr.f32.mxu0 %v728_v59 }
  0x55   : > { %423 = vmatmul.mubr.f32.gmra.mxu0 %v712_v58 }
  0x56   : > { %427 = vmatprep.mubr.f32.mxu0 %v714_v60 }
  0x59   : > { %428 = vmatmul.mubr.f32.gmra.mxu0 %v728_v59 }
  0x5a   : > { %432 = vmatprep.mubr.f32.mxu0 %v730_v61 }
  0x5d   : > { %433 = vmatmul.mubr.f32.gmra.mxu0 %v714_v60 }
  0x5e   : > { %437 = vmatprep.mubr.f32.mxu0 %v716_v62 }
  0x61   : > { %438 = vmatmul.mubr.f32.gmra.mxu0 %v730_v61 }
  0x62   : > { %442 = vmatprep.mubr.f32.mxu0 %v732_v63 }
  0x65   : > { %443 = vmatmul.mubr.f32.gmra.mxu0 %v716_v62 }
  0x66   : > { %447 = vmatprep.mubr.f32.mxu0 %v718_v0 }
  0x69   : > { %448 = vmatmul.mubr.f32.gmra.mxu0 %v732_v63 }
  0xed   : > { %v770_v2 = vpop.f32.mrf.mxu0 }
  0xef   : > { %v771_v3 = vpop.f32.mrf.mxu0 }
  0xf0   : > { %v772_v5 = vadd.f32 %v771_v3, %v770_v2  ;;  %v884_v6 = vpop.f32.mrf.mxu1 }
  0xf1   : > { %v773_v7 = vpop.f32.mrf.mxu0 }
  0xf2   : > { %v375_v8 = vadd.f32 %v772_v5, %v1173_v4  ;;  %v519_v9 = vpop.f32.mrf.mxu1 }
  0xf3   : > { %v774_v10 = vpop.f32.mrf.mxu0 }
  0xf4   : > { %v775_v11 = vadd.f32 %v774_v10, %v773_v7  ;;  %v520_v12 = vadd.f32 %v519_v9, %v375_v8  ;;  %v887_v14 = vpop.f32.mrf.mxu1 }
  0xf5   : > { %v776_v13 = vpop.f32.mrf.mxu0 }
  0xf6   : > { %v380_v15 = vadd.f32 %v775_v11, %v1173_v4  ;;  %598 = vst [vmem:[%s1179_s12] sm:$0xff] %v520_v12  ;;  %v529_v20 = vpop.f32.mrf.mxu1 }
  0xf7   : > { %v777_v16 = vpop.f32.mrf.mxu0 }
  0xf8   : > { %v525_v17 = vadd.f32 %v884_v6, %v380_v15  ;;  %v778_v18 = vadd.f32 %v777_v16, %v776_v13  ;;  %v890_v26 = vpop.f32.mrf.mxu1 }
  0xf9   : > { %v779_v19 = vpop.f32.mrf.mxu0 }
  0xfa   : > { %599 = vst [vmem:[%s1179_s12 + $0x8] sm:$0xff] %v525_v17  ;;  %v385_v21 = vadd.f32 %v778_v18, %v1173_v4  ;;  %v539_v32 = vpop.f32.mrf.mxu1 }
  0xfb   : > { %v780_v22 = vpop.f32.mrf.mxu0 }
  0xfc   : > { %v781_v23 = vadd.f32 %v780_v22, %v779_v19  ;;  %v530_v24 = vadd.f32 %v529_v20, %v385_v21  ;;  %v893_v38 = vpop.f32.mrf.mxu1 }
  0xfd   : > { %v782_v25 = vpop.f32.mrf.mxu0 }
  0xfe   : > { %v390_v27 = vadd.f32 %v781_v23, %v1173_v4  ;;  %600 = vst [vmem:[%s1179_s12 + $0x10] sm:$0xff] %v530_v24  ;;  %v549_v44 = vpop.f32.mrf.mxu1 }
  0xff   : > { %v783_v28 = vpop.f32.mrf.mxu0 }
 0x100   : > { %v535_v29 = vadd.f32 %v887_v14, %v390_v27  ;;  %v784_v30 = vadd.f32 %v783_v28, %v782_v25  ;;  %v896_v50 = vpop.f32.mrf.mxu1 }
 0x101   : > { %v785_v31 = vpop.f32.mrf.mxu0 }
 0x102   : > { %601 = vst [vmem:[%s1179_s12 + $0x18] sm:$0xff] %v535_v29  ;;  %v395_v33 = vadd.f32 %v784_v30, %v1173_v4  ;;  %v559_v56 = vpop.f32.mrf.mxu1 }
 0x103   : > { %v786_v34 = vpop.f32.mrf.mxu0 }
 0x104   : > { %v787_v35 = vadd.f32 %v786_v34, %v785_v31  ;;  %v540_v36 = vadd.f32 %v539_v32, %v395_v33  ;;  %v899_v62 = vpop.f32.mrf.mxu1 }
 0x105   : > { %v788_v37 = vpop.f32.mrf.mxu0 }
 0x106   : > { %v400_v39 = vadd.f32 %v787_v35, %v1173_v4  ;;  %602 = vst [vmem:[%s1179_s12 + $0x20] sm:$0xff] %v540_v36  ;;  %v569_v5 = vpop.f32.mrf.mxu1 }
 0x107   : > { %v789_v40 = vpop.f32.mrf.mxu0 }
 0x108   : > { %v545_v41 = vadd.f32 %v890_v26, %v400_v39  ;;  %v790_v42 = vadd.f32 %v789_v40, %v788_v37  ;;  %v902_v11 = vpop.f32.mrf.mxu1 }
 0x109   : > { %v791_v43 = vpop.f32.mrf.mxu0 }
 0x10a   : > { %603 = vst [vmem:[%s1179_s12 + $0x28] sm:$0xff] %v545_v41  ;;  %v405_v45 = vadd.f32 %v790_v42, %v1173_v4  ;;  %v579_v17 = vpop.f32.mrf.mxu1 }
 0x10b   : > { %v792_v46 = vpop.f32.mrf.mxu0 }
 0x10c   : > { %v793_v47 = vadd.f32 %v792_v46, %v791_v43  ;;  %v550_v48 = vadd.f32 %v549_v44, %v405_v45  ;;  %v905_v23 = vpop.f32.mrf.mxu1 }
 0x10d   : > { %v794_v49 = vpop.f32.mrf.mxu0 }
 0x10e   : > { %v410_v51 = vadd.f32 %v793_v47, %v1173_v4  ;;  %604 = vst [vmem:[%s1179_s12 + $0x30] sm:$0xff] %v550_v48  ;;  %v589_v29 = vpop.f32.mrf.mxu1 }
 0x10f   : > { %v795_v52 = vpop.f32.mrf.mxu0 }
 0x110   : > { %v555_v53 = vadd.f32 %v893_v38, %v410_v51  ;;  %v796_v54 = vadd.f32 %v795_v52, %v794_v49 }
 0x111   : > { %v797_v55 = vpop.f32.mrf.mxu0 }
 0x112   : > { %605 = vst [vmem:[%s1179_s12 + $0x38] sm:$0xff] %v555_v53  ;;  %v415_v57 = vadd.f32 %v796_v54, %v1173_v4 }
 0x113   : > { %v798_v58 = vpop.f32.mrf.mxu0 }
 0x114   : > { %v799_v59 = vadd.f32 %v798_v58, %v797_v55  ;;  %v560_v60 = vadd.f32 %v559_v56, %v415_v57 }
 0x115   : > { %v800_v61 = vpop.f32.mrf.mxu0 }
 0x116   : > { %v420_v63 = vadd.f32 %v799_v59, %v1173_v4  ;;  %606 = vst [vmem:[%s1179_s12 + $0x40] sm:$0xff] %v560_v60 }
 0x117   : > { %v801_v0 = vpop.f32.mrf.mxu0 }
 0x118   : > { %v565_v1 = vadd.f32 %v896_v50, %v420_v63  ;;  %v802_v2 = vadd.f32 %v801_v0, %v800_v61 }
 0x119   : > { %v803_v3 = vpop.f32.mrf.mxu0 }
 0x11a   : > { %607 = vst [vmem:[%s1179_s12 + $0x48] sm:$0xff] %v565_v1  ;;  %v425_v6 = vadd.f32 %v802_v2, %v1173_v4 }
 0x11b   : > { %v804_v7 = vpop.f32.mrf.mxu0 }
 0x11c   : > { %v805_v8 = vadd.f32 %v804_v7, %v803_v3  ;;  %v570_v9 = vadd.f32 %v569_v5, %v425_v6 }
 0x11d   : > { %v806_v10 = vpop.f32.mrf.mxu0 }
 0x11e   : > { %v430_v12 = vadd.f32 %v805_v8, %v1173_v4  ;;  %608 = vst [vmem:[%s1179_s12 + $0x50] sm:$0xff] %v570_v9 }
 0x11f   : > { %v807_v13 = vpop.f32.mrf.mxu0 }
 0x120   : > { %v575_v14 = vadd.f32 %v899_v62, %v430_v12  ;;  %v808_v15 = vadd.f32 %v807_v13, %v806_v10 }
 0x121   : > { %v809_v16 = vpop.f32.mrf.mxu0 }
 0x122   : > { %609 = vst [vmem:[%s1179_s12 + $0x58] sm:$0xff] %v575_v14  ;;  %v435_v18 = vadd.f32 %v808_v15, %v1173_v4 }
 0x123   : > { %v810_v19 = vpop.f32.mrf.mxu0 }
 0x124   : > { %v811_v20 = vadd.f32 %v810_v19, %v809_v16  ;;  %v580_v21 = vadd.f32 %v579_v17, %v435_v18 }
 0x125   : > { %v812_v22 = vpop.f32.mrf.mxu0 }
 0x126   : > { %v440_v24 = vadd.f32 %v811_v20, %v1173_v4  ;;  %610 = vst [vmem:[%s1179_s12 + $0x60] sm:$0xff] %v580_v21 }
 0x127   : > { %v813_v25 = vpop.f32.mrf.mxu0 }
 0x128   : > { %v585_v26 = vadd.f32 %v902_v11, %v440_v24  ;;  %v814_v27 = vadd.f32 %v813_v25, %v812_v22 }
 0x129   : > { %v815_v28 = vpop.f32.mrf.mxu0 }
 0x12a   : > { %611 = vst [vmem:[%s1179_s12 + $0x68] sm:$0xff] %v585_v26  ;;  %v445_v30 = vadd.f32 %v814_v27, %v1173_v4 }
 0x12b   : > { %v816_v31 = vpop.f32.mrf.mxu0 }
 0x12c   : > { %v817_v32 = vadd.f32 %v816_v31, %v815_v28  ;;  %v590_v33 = vadd.f32 %v589_v29, %v445_v30 }
 0x12e   : > { %v450_v34 = vadd.f32 %v817_v32, %v1173_v4  ;;  %612 = vst [vmem:[%s1179_s12 + $0x70] sm:$0xff] %v590_v33 }
 0x130   : > { %v595_v35 = vadd.f32 %v905_v23, %v450_v34 }
 0x132   : > { %613 = vst [vmem:[%s1179_s12 + $0x78] sm:$0xff] %v595_v35 }
 0x133 PF: > { %s13_s14 = sadd.s32 1, %s953_s14   ;;  %s1225_s12 = smov %s949_s13 }
 0x134   : > { %p10_p6 = scmp.ge.s32.totalorder %s13_s14, 4   ;;  %s1226_s13 = smov %s1228_s15 }
 0x136   :  { %12 = sbr.rel (!%p10_p6) target bundleno = 2 (0x2), region = 64 }

</bundles_post_ra>
